<compile_context>
chip_gen: v5e
topology: v5e:2x2
jax: 0.10.0
libtpu: 0.0.40
codegen_flags: <defaults>
</compile_context>

<pallas_src>
import functools
import math

import jax
import jax.numpy as jnp
from jax.experimental import pallas as pl
from jax.experimental.pallas import tpu as pltpu

LANE = 128
_MIB = 1024 * 1024


# --------------------------------------------------------------------------- #
# small helpers
# --------------------------------------------------------------------------- #
def _round_up(v, m):
    return ((v + m - 1) // m) * m


def _cdiv(a, b):
    return (a + b - 1) // b


def _pad2d(a, rows, cols):
    pr, pc = rows - a.shape[0], cols - a.shape[1]
    if pr or pc:
        a = jnp.pad(a, ((0, pr), (0, pc)))
    return a


def _vmem_capacity_bytes():
    """Per-generation VMEM capacity (v5e/v6e: 128 MiB, v7x: 64 MiB)."""
    try:
        info = pltpu.get_tpu_info()
        cap = getattr(info, "vmem_capacity_bytes", None)
        if cap:
            return int(cap)
    except Exception:
        pass
    try:
        kind = jax.devices()[0].device_kind.lower()
        if ("v5" in kind) or ("v6" in kind):
            return 128 * _MIB
    except Exception:
        pass
    return 64 * _MIB  # conservative default (v7x)


def _tensorcores_per_chip():
    """Best effort: 2 on v7x, else 1 (v5e/v6e have a single TensorCore)."""
    try:
        kind = jax.devices()[0].device_kind.lower()
        if ("v7" in kind) or ("tpu7" in kind) or ("7x" in kind):
            return 2
    except Exception:
        pass
    return 1


def _spec(shape, index_map, buffers=None):
    """BlockSpec; buffers=1 single-buffers a grid-invariant block (halves its VMEM)."""
    if buffers is not None and hasattr(pl, "Buffered"):
        try:
            return pl.BlockSpec(shape, index_map, pipeline_mode=pl.Buffered(buffers))
        except (TypeError, AttributeError):
            pass
    return pl.BlockSpec(shape, index_map)


def _pick_tile_n(out_size, requested):
    """Lane-dense OUT tile.  Prefer 256-aligned tiles (MXU is 2x256^2 on v6e/v7x)
    and pad OUT up to a tile multiple rather than degrading the tile to 128."""
    out_l = _round_up(out_size, LANE)
    t_max = max(LANE, (min(int(requested), out_l) // LANE) * LANE)
    if out_l <= t_max:                       # a single tile covers everything
        return out_l, out_l
    if t_max < 256:                          # user explicitly asked for a 128 tile
        return t_max, out_l
    # largest tile <= t_max that divides the lane-padded OUT (256-aligned first)
    for step in (256, LANE):
        c = t_max - t_max % step
        while c >= 256:
            if out_l % c == 0:
                return c, out_l
            c -= step
    # no good divisor: keep a 256-aligned tile and pad OUT up, unless the padding
    # would waste >25% compute, in which case fall back to a 128-aligned divisor.
    t = max(256, t_max - t_max % 256)
    out_p = _round_up(out_l, t)
    if out_p - out_l > out_l // 4:
        c = t_max - t_max % LANE
        while c >= LANE:
            if out_l % c == 0:
                return c, out_l
            c -= LANE
    return t, out_p


# --------------------------------------------------------------------------- #
# kernel
# --------------------------------------------------------------------------- #
def _res_block_kernel(x_ref, w1_ref, b1_ref, w2_ref, b2_ref, o_ref, hx_ref, *,
                      skip_is_weight, tile_n, in_p):
    """One (batch_tile, out_tile) grid step.

    x_ref  : (tb, IN_p)    x tile; compute dtype (fused skip) or original dtype (identity)
    w1_ref : (IN_p, HID_p) compute dtype, grid-invariant (single-buffered)
    b1_ref : (1, HID_p)    f32, grid-invariant
    w2_ref : (K2, tn)      compute dtype, OUT-tiled stream.
                           identity skip: K2 = HID_p, holds W2*s
                           Linear skip  : K2 = IN_p+HID_p, holds [W_skip ; W2*s]
    b2_ref : (1, tn)       f32, scale pre-folded, OUT-tiled
    o_ref  : (tb, tn)      output dtype
    hx_ref : (tb, K2)      compute-dtype VMEM scratch, persists across OUT tiles:
                           h = relu(x@W1+b1), or [x | h] when the skip is fused.
    """
    j = pl.program_id(1)

    # Build the second-matmul LHS once per batch tile; reuse it for every OUT tile.
    @pl.when(j == 0)
    def _():
        x = x_ref[...].astype(w1_ref.dtype)
        h = jnp.dot(x, w1_ref[...], preferred_element_type=jnp.float32)
        h = jnp.maximum(h + b1_ref[...], 0.0).astype(hx_ref.dtype)
        if skip_is_weight:
            hx_ref[:, :in_p] = x.astype(hx_ref.dtype)
            hx_ref[:, in_p:] = h
        else:
            hx_ref[...] = h

    # Linear skip: identity + residual*scale in ONE MXU pass ([x|h] @ [W_skip;W2*s]).
    # Identity skip: plain h @ (W2*s); the skip add happens below.
    acc = jnp.dot(hx_ref[...], w2_ref[...], preferred_element_type=jnp.float32)
    acc = acc + b2_ref[...]
    if not skip_is_weight:
        # nn.Identity(): add the matching OUT columns straight from the resident
        # x tile (IN_p == OUT_p).  x keeps its original dtype -> exact skip add.
        off = pl.multiple_of(j * tile_n, LANE)
        acc = acc + x_ref[:, pl.ds(off, tile_n)].astype(jnp.float32)

    o_ref[...] = jnp.maximum(acc, 0.0).astype(o_ref.dtype)


# --------------------------------------------------------------------------- #
# parameter packing (done once, outside the per-forward path)
# --------------------------------------------------------------------------- #
def pack_res_block_params(w1, b1, w2, b2, ws=None, *, scale_factor=1.0,
                          compute_dtype=None, tile_n=512):
    """Pad, cast to the compute dtype, fold scale_factor into layer2, and fuse the
    skip weight with W2 -- once.  The kernel is then the only consumer of weight
    HBM bandwidth.

    w1 : [IN, HID]   b1 : [HID]
    w2 : [HID, OUT]  b2 : [OUT]
    ws : [IN, OUT] skip weight, or None for nn.Identity() (requires IN == OUT).
    compute_dtype: matmul operand dtype. bf16 is ~2x on the MXU on v5e/v6e/v7x;
                   accumulation and the bias/ReLU/add epilogue stay f32.
    """
    IN, HID = w1.shape
    OUT = w2.shape[1]
    skip_is_weight = ws is not None
    if not skip_is_weight and IN != OUT:
        raise ValueError("identity skip requires input_size == output_size")

    cdt = jnp.dtype(compute_dtype) if compute_dtype is not None else jnp.dtype(w1.dtype)
    f32 = jnp.float32
    s = float(scale_factor)

    tile_n, OUT_p = _pick_tile_n(OUT, tile_n)
    HID_p = _round_up(HID, LANE)
    # identity skip slices x columns in-kernel -> x must be padded like OUT.
    IN_p = OUT_p if not skip_is_weight else _round_up(IN, LANE)

    w1_p = _pad2d(w1.astype(f32), IN_p, HID_p).astype(cdt)
    b1_p = jnp.pad(b1.astype(f32), (0, HID_p - HID)).reshape(1, HID_p)
    b2_p = jnp.pad(b2.astype(f32) * s, (0, OUT_p - OUT)).reshape(1, OUT_p)
    if skip_is_weight:
        # K-stacked [W_skip ; W2*s]: one streamed weight, one MXU pass per OUT tile.
        w_main = jnp.concatenate(
            [_pad2d(ws.astype(f32), IN_p, OUT_p),
             _pad2d(w2.astype(f32) * s, HID_p, OUT_p)], axis=0).astype(cdt)
    else:
        w_main = _pad2d(w2.astype(f32) * s, HID_p, OUT_p).astype(cdt)

    return dict(w1=w1_p, b1=b1_p, w_main=w_main, b2=b2_p,
                skip_is_weight=skip_is_weight, compute_dtype=cdt,
                IN=IN, OUT=OUT, IN_p=IN_p, HID_p=HID_p, OUT_p=OUT_p,
                tile_n=tile_n)


# --------------------------------------------------------------------------- #
# forward
# --------------------------------------------------------------------------- #
def res_block_apply(params, x, *, tile_b=256):
    """Run the fused Res_Block kernel on pre-packed parameters.  x: [B, IN]."""
    B, IN = x.shape
    if IN != params["IN"]:
        raise ValueError(f"expected input size {params['IN']}, got {IN}")

    skip_is_weight = params["skip_is_weight"]
    cdt = params["compute_dtype"]
    IN_p, HID_p, OUT_p = params["IN_p"], params["HID_p"], params["OUT_p"]
    tile_n, OUT = params["tile_n"], params["OUT"]
    w1_p, b1_p, w_main, b2_p = params["w1"], params["b1"], params["w_main"], params["b2"]
    K2 = w_main.shape[0]
    out_dtype = x.dtype

    # ---- batch tile -------------------------------------------------------
    sub = 16 if cdt == jnp.bfloat16 else 8
    tile_b = max(sub, min(int(tile_b), _round_up(B, sub)))
    tile_b = _round_up(tile_b, sub)
    # v7x has 2 TensorCores: keep >=2 steps on the "parallel" batch axis when the
    # batch allows it so both cores get work (no-op on v5e/v6e).
    if _tensorcores_per_chip() >= 2 and B > sub:
        tile_b = min(tile_b, max(sub, _round_up(_cdiv(B, 2), sub)))

    # x: original dtype for the identity skip (exact skip add even with bf16
    # matmuls); compute dtype when the skip is fused into the streamed weight.
    x_dt = cdt if skip_is_weight else jnp.dtype(x.dtype)
    x_item = jnp.dtype(x_dt).itemsize
    w_item = cdt.itemsize
    out_item = jnp.dtype(out_dtype).itemsize

    # ---- VMEM budget (per-generation capacity, headroom for Mosaic scratch) ----
    cap_allowed = int(_vmem_capacity_bytes() * 0.85)

    def vmem_needed(tb):         # conservative: assume everything double-buffered
        return (2 * tb * IN_p * x_item
                + 2 * (IN_p * HID_p * w_item + HID_p * 4)
                + 2 * (K2 * tile_n * w_item + tile_n * 4)
                + 2 * tb * tile_n * out_item
                + tb * K2 * w_item)

    while tile_b > sub and vmem_needed(tile_b) > cap_allowed:
        tile_b = max(sub, _round_up(tile_b // 2, sub))
    # TODO(synk): if W1 alone exceeds the VMEM budget (very large IN*HID), add a
    # third grid axis over HID and accumulate h in the scratch instead of failing.

    B_p = _round_up(B, tile_b)
    nb, nj = B_p // tile_b, OUT_p // tile_n
    x_p = _pad2d(x, B_p, IN_p).astype(x_dt)

    vmem_limit = int(min(cap_allowed, max(32 * _MIB, vmem_needed(tile_b) * 5 // 4)))

    # ---- advisory cost estimate (weights re-streamed once per batch tile) ----
    flops = 2 * B_p * (IN_p * HID_p + K2 * OUT_p)
    bytes_accessed = (B_p * IN_p * x_item
                      + IN_p * HID_p * w_item + HID_p * 4
                      + nb * (K2 * OUT_p * w_item + OUT_p * 4)
                      + B_p * OUT_p * out_item)

    kernel = functools.partial(_res_block_kernel, skip_is_weight=skip_is_weight,
                               tile_n=tile_n, in_p=IN_p)

    def run(single_buffer_invariant):
        inv = 1 if single_buffer_invariant else None
        grid_spec = pltpu.PrefetchScalarGridSpec(
            num_scalar_prefetch=0,
            grid=(nb, nj),
            in_specs=[
                _spec((tile_b, IN_p), lambda i, j: (i, 0)),              # x tile
                _spec((IN_p, HID_p), lambda i, j: (0, 0), buffers=inv),  # W1 (grid-invariant)
                _spec((1, HID_p), lambda i, j: (0, 0), buffers=inv),     # b1 (f32)
                _spec((K2, tile_n), lambda i, j: (0, j)),                # W2*s or [Wskip;W2*s]
                _spec((1, tile_n), lambda i, j: (0, j)),                 # b2*s (f32)
            ],
            out_specs=pl.BlockSpec((tile_b, tile_n), lambda i, j: (i, j)),
            scratch_shapes=[pltpu.VMEM((tile_b, K2), cdt)],              # [x|h] / h scratch
        )
        return pl.pallas_call(
            kernel,
            out_shape=jax.ShapeDtypeStruct((B_p, OUT_p), out_dtype),
            grid_spec=grid_spec,
            compiler_params=pltpu.CompilerParams(
                dimension_semantics=("parallel", "arbitrary"),
                vmem_limit_bytes=vmem_limit),
            cost_estimate=pl.CostEstimate(flops=flops, transcendentals=0,
                                          bytes_accessed=bytes_accessed),
        )(x_p, w1_p, b1_p, w_main, b2_p)

    try:
        out_p = run(True)          # single-buffered grid-invariant W1/b1
    except Exception:
        # pipeline_mode=pl.Buffered(1) not supported by this JAX/Mosaic build ->
        # fall back to default double-buffering (identical numerics).
        out_p = run(False)

    return out_p[:B, :OUT]


def res_block_forward(x, w1, b1, w2, b2, ws=None, *, scale_factor=1.0,
                      tile_b=256, tile_n=512, compute_dtype=None):
    """Convenience wrapper: pack params + apply.  Prefer pack_res_block_params()
    once + res_block_apply() per step so weights are not re-padded every call."""
    params = pack_res_block_params(w1, b1, w2, b2, ws, scale_factor=scale_factor,
                                   compute_dtype=compute_dtype, tile_n=tile_n)
    return res_block_apply(params, x, tile_b=tile_b)


# --------------------------------------------------------------------------- #
# reference + init
# --------------------------------------------------------------------------- #
def make_res_block_params(key, input_size, output_size, hidden_size,
                          dtype=jnp.float32):
    """PyTorch-style uniform fan-in init; weights returned transposed to [in, out].
    Returns ws=None when input_size == output_size (nn.Identity skip)."""
    k1, k2, k3, k4, k5 = jax.random.split(key, 5)

    def uinit(k, shape, fan_in):
        bound = 1.0 / math.sqrt(fan_in)
        return jax.random.uniform(k, shape, dtype, minval=-bound, maxval=bound)

    w1 = uinit(k1, (input_size, hidden_size), input_size)
    b1 = uinit(k2, (hidden_size,), input_size)
    w2 = uinit(k3, (hidden_size, output_size), hidden_size)
    b2 = uinit(k4, (output_size,), hidden_size)
    ws = (uinit(k5, (input_size, output_size), input_size)
          if input_size != output_size else None)
    return w1, b1, w2, b2, ws


def res_block_reference(x, w1, b1, w2, b2, ws, scale_factor):
    identity = x @ ws if ws is not None else x
    o = jax.nn.relu(x @ w1 + b1)
    residual = o @ w2 + b2
    return jax.nn.relu(identity + residual * scale_factor)


if __name__ == "__main__":
    key = jax.random.PRNGKey(0)
    kx1, kp1, kx2, kp2 = jax.random.split(key, 4)

    # Case 1: input_size != output_size -> Linear skip, fused into the W2 matmul.
    # Params packed once and reused; batch not divisible by the tile (padding path).
    B1, IN1, HID1, OUT1, S1 = 48, 16, 32, 24, 0.5
    x1 = jax.random.normal(kx1, (B1, IN1), dtype=jnp.float32)
    p1 = make_res_block_params(kp1, IN1, OUT1, HID1)
    packed1 = pack_res_block_params(*p1, scale_factor=S1)
    out1 = jax.block_until_ready(res_block_apply(packed1, x1, tile_b=32))
    ref1 = res_block_reference(x1, *p1, S1)
    assert out1.shape == (B1, OUT1)
    assert jnp.allclose(out1, ref1, atol=1e-5, rtol=1e-5), "mismatch (skip-linear case)"

    # Case 2: input_size == output_size -> nn.Identity skip (sliced from the
    # resident x tile: no second x stream, exact f32 skip add).
    B2, IN2, HID2, OUT2, S2 = 16, 24, 32, 24, 2.0
    x2 = jax.random.normal(kx2, (B2, IN2), dtype=jnp.float32)
    p2 = make_res_block_params(kp2, IN2, OUT2, HID2)
    out2 = jax.block_until_ready(res_block_forward(x2, *p2, scale_factor=S2))
    ref2 = res_block_reference(x2, *p2, S2)
    assert out2.shape == (B2, OUT2)
    assert jnp.allclose(out2, ref2, atol=1e-5, rtol=1e-5), "mismatch (identity case)"

    # Case 3: bf16 matmul operands (a win on v5e/v6e/v7x); f32 accumulation + epilogue.
    out3 = jax.block_until_ready(
        res_block_forward(x1, *p1, scale_factor=S1, tile_b=32,
                          compute_dtype=jnp.bfloat16))
    assert out3.shape == (B1, OUT1)
    assert bool(jnp.all(jnp.isfinite(out3)))
    assert jnp.allclose(out3, ref1, atol=1e-1, rtol=1e-1), "bf16 path too far off"

    print("KERNEL_OK")
</pallas_src>

<mosaic_0001>
module attributes {stable_mosaic.version = 11 : i64} {
  func.func @_res_block_kernel(%arg0: i32, %arg1: i32, %arg2: memref<32x128xf32, #tpu.memory_space<vmem>>, %arg3: memref<128x128xf32, #tpu.memory_space<vmem>>, %arg4: memref<1x128xf32, #tpu.memory_space<vmem>>, %arg5: memref<256x128xf32, #tpu.memory_space<vmem>>, %arg6: memref<1x128xf32, #tpu.memory_space<vmem>>, %arg7: memref<32x128xf32, #tpu.memory_space<vmem>>, %arg8: memref<32x256xf32, #tpu.memory_space<vmem>>) attributes {dimension_semantics = [#tpu.dimension_semantics<parallel>, #tpu.dimension_semantics<arbitrary>], iteration_bounds = array<i64: 2, 1>, scalar_prefetch = 0 : i64, scratch_operands = 1 : i64, tpu.core_type = #tpu.core_type<tc>, window_params = [{transform_indices = @transform_0, window_bounds = array<i64: 32, 128>}, {pipeline_mode = #tpu.pipeline_mode<synchronous>, transform_indices = @transform_1, window_bounds = array<i64: 128, 128>}, {pipeline_mode = #tpu.pipeline_mode<synchronous>, transform_indices = @transform_2, window_bounds = array<i64: 1, 128>}, {transform_indices = @transform_3, window_bounds = array<i64: 256, 128>}, {transform_indices = @transform_4, window_bounds = array<i64: 1, 128>}, {transform_indices = @transform_5, window_bounds = array<i64: 32, 128>}]} {
    %c0_i32 = arith.constant 0 : i32
    %0 = arith.cmpi eq, %arg1, %c0_i32 : i32
    %1 = arith.extui %0 : i1 to i32
    %c0_i32_0 = arith.constant 0 : i32
    %2 = arith.cmpi ne, %1, %c0_i32_0 : i32
    scf.if %2 {
      %c0_9 = arith.constant 0 : index
      %c0_10 = arith.constant 0 : index
      %12 = vector.load %arg2[%c0_9, %c0_10] : memref<32x128xf32, #tpu.memory_space<vmem>>, vector<32x128xf32>
      %c0_11 = arith.constant 0 : index
      %c0_12 = arith.constant 0 : index
      %13 = vector.load %arg3[%c0_11, %c0_12] : memref<128x128xf32, #tpu.memory_space<vmem>>, vector<128x128xf32>
      %cst_13 = arith.constant dense<0.000000e+00> : vector<32x128xf32>
      %14 = tpu.matmul %12, %13, %cst_13 {dimension_numbers = #tpu.dot_dimension_numbers<[1], [0], [0], [1], [0, 0, 1, 1], [], []>} : vector<32x128xf32>, vector<128x128xf32>, vector<32x128xf32> -> vector<32x128xf32>
      %c0_14 = arith.constant 0 : index
      %c0_15 = arith.constant 0 : index
      %15 = vector.load %arg4[%c0_14, %c0_15] : memref<1x128xf32, #tpu.memory_space<vmem>>, vector<1x128xf32>
      %16 = vector.broadcast %15 : vector<1x128xf32> to vector<32x128xf32>
      %17 = arith.addf %14, %16 : vector<32x128xf32>
      %cst_16 = arith.constant 0.000000e+00 : f32
      %18 = vector.broadcast %cst_16 : f32 to vector<32x128xf32>
      %19 = arith.maximumf %17, %18 : vector<32x128xf32>
      %c0_17 = arith.constant 0 : index
      %c0_18 = arith.constant 0 : index
      %20 = vector.load %arg8[%c0_17, %c0_18] : memref<32x256xf32, #tpu.memory_space<vmem>>, vector<32x128xf32>
      tpu.vector_store %arg8[%c0_17, %c0_18], %12 {strides = array<i32>} : memref<32x256xf32, #tpu.memory_space<vmem>>, vector<32x128xf32>,
      %c0_19 = arith.constant 0 : index
      %c128 = arith.constant 128 : index
      %21 = vector.load %arg8[%c0_19, %c128] : memref<32x256xf32, #tpu.memory_space<vmem>>, vector<32x128xf32>
      tpu.vector_store %arg8[%c0_19, %c128], %19 {strides = array<i32>} : memref<32x256xf32, #tpu.memory_space<vmem>>, vector<32x128xf32>,
    } else {
    }
    %c0 = arith.constant 0 : index
    %c0_1 = arith.constant 0 : index
    %3 = vector.load %arg8[%c0, %c0_1] : memref<32x256xf32, #tpu.memory_space<vmem>>, vector<32x256xf32>
    %c0_2 = arith.constant 0 : index
    %c0_3 = arith.constant 0 : index
    %4 = vector.load %arg5[%c0_2, %c0_3] : memref<256x128xf32, #tpu.memory_space<vmem>>, vector<256x128xf32>
    %cst = arith.constant dense<0.000000e+00> : vector<32x128xf32>
    %5 = tpu.matmul %3, %4, %cst {dimension_numbers = #tpu.dot_dimension_numbers<[1], [0], [0], [1], [0, 0, 1, 1], [], []>} : vector<32x256xf32>, vector<256x128xf32>, vector<32x128xf32> -> vector<32x128xf32>
    %c0_4 = arith.constant 0 : index
    %c0_5 = arith.constant 0 : index
    %6 = vector.load %arg6[%c0_4, %c0_5] : memref<1x128xf32, #tpu.memory_space<vmem>>, vector<1x128xf32>
    %7 = vector.broadcast %6 : vector<1x128xf32> to vector<32x128xf32>
    %8 = arith.addf %5, %7 : vector<32x128xf32>
    %cst_6 = arith.constant 0.000000e+00 : f32
    %9 = vector.broadcast %cst_6 : f32 to vector<32x128xf32>
    %10 = arith.maximumf %8, %9 : vector<32x128xf32>
    %c0_7 = arith.constant 0 : index
    %c0_8 = arith.constant 0 : index
    %11 = vector.load %arg7[%c0_7, %c0_8] : memref<32x128xf32, #tpu.memory_space<vmem>>, vector<32x128xf32>
    tpu.vector_store %arg7[%c0_7, %c0_8], %10 {strides = array<i32>} : memref<32x128xf32, #tpu.memory_space<vmem>>, vector<32x128xf32>,
    return
  }
  func.func @transform_0(%arg0: i32, %arg1: i32) -> (i32, i32) {
    %c0_i32 = arith.constant 0 : i32
    %c0_i32_0 = arith.constant 0 : i32
    return %arg0, %c0_i32 : i32, i32
  }
  func.func @transform_1(%arg0: i32, %arg1: i32) -> (i32, i32) {
    %c0_i32 = arith.constant 0 : i32
    %c0_i32_0 = arith.constant 0 : i32
    %c0_i32_1 = arith.constant 0 : i32
    return %c0_i32, %c0_i32_0 : i32, i32
  }
  func.func @transform_2(%arg0: i32, %arg1: i32) -> (i32, i32) {
    %c0_i32 = arith.constant 0 : i32
    %c0_i32_0 = arith.constant 0 : i32
    %c0_i32_1 = arith.constant 0 : i32
    return %c0_i32, %c0_i32_0 : i32, i32
  }
  func.func @transform_3(%arg0: i32, %arg1: i32) -> (i32, i32) {
    %c0_i32 = arith.constant 0 : i32
    %c0_i32_0 = arith.constant 0 : i32
    return %c0_i32, %arg1 : i32, i32
  }
  func.func @transform_4(%arg0: i32, %arg1: i32) -> (i32, i32) {
    %c0_i32 = arith.constant 0 : i32
    %c0_i32_0 = arith.constant 0 : i32
    return %c0_i32, %arg1 : i32, i32
  }
  func.func @transform_5(%arg0: i32, %arg1: i32) -> (i32, i32) {
    %c0_i32 = arith.constant 0 : i32
    return %arg0, %arg1 : i32, i32
  }
}

module attributes {stable_mosaic.version = 11 : i64} {
  func.func @_res_block_kernel(%arg0: i32, %arg1: i32, %arg2: memref<32x128xf32, #tpu.memory_space<vmem>>, %arg3: memref<128x128xf32, #tpu.memory_space<vmem>>, %arg4: memref<1x128xf32, #tpu.memory_space<vmem>>, %arg5: memref<256x128xf32, #tpu.memory_space<vmem>>, %arg6: memref<1x128xf32, #tpu.memory_space<vmem>>, %arg7: memref<32x128xf32, #tpu.memory_space<vmem>>, %arg8: memref<32x256xf32, #tpu.memory_space<vmem>>) attributes {dimension_semantics = [#tpu.dimension_semantics<parallel>, #tpu.dimension_semantics<arbitrary>], iteration_bounds = array<i64: 2, 1>, scalar_prefetch = 0 : i64, scratch_operands = 1 : i64, tpu.core_type = #tpu.core_type<tc>, window_params = [{transform_indices = @transform_0, window_bounds = array<i64: 32, 128>}, {pipeline_mode = #tpu.pipeline_mode<synchronous>, transform_indices = @transform_1, window_bounds = array<i64: 128, 128>}, {pipeline_mode = #tpu.pipeline_mode<synchronous>, transform_indices = @transform_2, window_bounds = array<i64: 1, 128>}, {transform_indices = @transform_3, window_bounds = array<i64: 256, 128>}, {transform_indices = @transform_4, window_bounds = array<i64: 1, 128>}, {transform_indices = @transform_5, window_bounds = array<i64: 32, 128>}]} {
    %c0_i32 = arith.constant 0 : i32
    %0 = arith.cmpi eq, %arg1, %c0_i32 : i32
    %1 = arith.extui %0 : i1 to i32
    %c0_i32_0 = arith.constant 0 : i32
    %2 = arith.cmpi ne, %1, %c0_i32_0 : i32
    scf.if %2 {
      %c0_9 = arith.constant 0 : index
      %c0_10 = arith.constant 0 : index
      %12 = vector.load %arg2[%c0_9, %c0_10] : memref<32x128xf32, #tpu.memory_space<vmem>>, vector<32x128xf32>
      %c0_11 = arith.constant 0 : index
      %c0_12 = arith.constant 0 : index
      %13 = vector.load %arg3[%c0_11, %c0_12] : memref<128x128xf32, #tpu.memory_space<vmem>>, vector<128x128xf32>
      %cst_13 = arith.constant dense<0.000000e+00> : vector<32x128xf32>
      %14 = tpu.matmul %12, %13, %cst_13 {dimension_numbers = #tpu.dot_dimension_numbers<[1], [0], [0], [1], [0, 0, 1, 1], [], []>} : vector<32x128xf32>, vector<128x128xf32>, vector<32x128xf32> -> vector<32x128xf32>
      %c0_14 = arith.constant 0 : index
      %c0_15 = arith.constant 0 : index
      %15 = vector.load %arg4[%c0_14, %c0_15] : memref<1x128xf32, #tpu.memory_space<vmem>>, vector<1x128xf32>
      %16 = vector.broadcast %15 : vector<1x128xf32> to vector<32x128xf32>
      %17 = arith.addf %14, %16 : vector<32x128xf32>
      %cst_16 = arith.constant 0.000000e+00 : f32
      %18 = vector.broadcast %cst_16 : f32 to vector<32x128xf32>
      %19 = arith.maximumf %17, %18 : vector<32x128xf32>
      %c0_17 = arith.constant 0 : index
      %c0_18 = arith.constant 0 : index
      %20 = vector.load %arg8[%c0_17, %c0_18] : memref<32x256xf32, #tpu.memory_space<vmem>>, vector<32x128xf32>
      tpu.vector_store %arg8[%c0_17, %c0_18], %12 {strides = array<i32>} : memref<32x256xf32, #tpu.memory_space<vmem>>, vector<32x128xf32>,
      %c0_19 = arith.constant 0 : index
      %c128 = arith.constant 128 : index
      %21 = vector.load %arg8[%c0_19, %c128] : memref<32x256xf32, #tpu.memory_space<vmem>>, vector<32x128xf32>
      tpu.vector_store %arg8[%c0_19, %c128], %19 {strides = array<i32>} : memref<32x256xf32, #tpu.memory_space<vmem>>, vector<32x128xf32>,
    } else {
    }
    %c0 = arith.constant 0 : index
    %c0_1 = arith.constant 0 : index
    %3 = vector.load %arg8[%c0, %c0_1] : memref<32x256xf32, #tpu.memory_space<vmem>>, vector<32x256xf32>
    %c0_2 = arith.constant 0 : index
    %c0_3 = arith.constant 0 : index
    %4 = vector.load %arg5[%c0_2, %c0_3] : memref<256x128xf32, #tpu.memory_space<vmem>>, vector<256x128xf32>
    %cst = arith.constant dense<0.000000e+00> : vector<32x128xf32>
    %5 = tpu.matmul %3, %4, %cst {dimension_numbers = #tpu.dot_dimension_numbers<[1], [0], [0], [1], [0, 0, 1, 1], [], []>} : vector<32x256xf32>, vector<256x128xf32>, vector<32x128xf32> -> vector<32x128xf32>
    %c0_4 = arith.constant 0 : index
    %c0_5 = arith.constant 0 : index
    %6 = vector.load %arg6[%c0_4, %c0_5] : memref<1x128xf32, #tpu.memory_space<vmem>>, vector<1x128xf32>
    %7 = vector.broadcast %6 : vector<1x128xf32> to vector<32x128xf32>
    %8 = arith.addf %5, %7 : vector<32x128xf32>
    %cst_6 = arith.constant 0.000000e+00 : f32
    %9 = vector.broadcast %cst_6 : f32 to vector<32x128xf32>
    %10 = arith.maximumf %8, %9 : vector<32x128xf32>
    %c0_7 = arith.constant 0 : index
    %c0_8 = arith.constant 0 : index
    %11 = vector.load %arg7[%c0_7, %c0_8] : memref<32x128xf32, #tpu.memory_space<vmem>>, vector<32x128xf32>
    tpu.vector_store %arg7[%c0_7, %c0_8], %10 {strides = array<i32>} : memref<32x128xf32, #tpu.memory_space<vmem>>, vector<32x128xf32>,
    return
  }
  func.func @transform_0(%arg0: i32, %arg1: i32) -> (i32, i32) {
    %c0_i32 = arith.constant 0 : i32
    %c0_i32_0 = arith.constant 0 : i32
    return %arg0, %c0_i32 : i32, i32
  }
  func.func @transform_1(%arg0: i32, %arg1: i32) -> (i32, i32) {
    %c0_i32 = arith.constant 0 : i32
    %c0_i32_0 = arith.constant 0 : i32
    %c0_i32_1 = arith.constant 0 : i32
    return %c0_i32, %c0_i32_0 : i32, i32
  }
  func.func @transform_2(%arg0: i32, %arg1: i32) -> (i32, i32) {
    %c0_i32 = arith.constant 0 : i32
    %c0_i32_0 = arith.constant 0 : i32
    %c0_i32_1 = arith.constant 0 : i32
    return %c0_i32, %c0_i32_0 : i32, i32
  }
  func.func @transform_3(%arg0: i32, %arg1: i32) -> (i32, i32) {
    %c0_i32 = arith.constant 0 : i32
    %c0_i32_0 = arith.constant 0 : i32
    return %c0_i32, %arg1 : i32, i32
  }
  func.func @transform_4(%arg0: i32, %arg1: i32) -> (i32, i32) {
    %c0_i32 = arith.constant 0 : i32
    %c0_i32_0 = arith.constant 0 : i32
    return %c0_i32, %arg1 : i32, i32
  }
  func.func @transform_5(%arg0: i32, %arg1: i32) -> (i32, i32) {
    %c0_i32 = arith.constant 0 : i32
    return %arg0, %arg1 : i32, i32
  }
}

</mosaic_0001>

<bundles_post_ra>
// kernel: tpu_custom_call.1
= control target key start
LH: loop header
LB: loop body
LE: loop exit
PB: predicated region body
PF: predicated region fallthrough
CT: control target
= control target key end

     0   :  { %s1139_s0 = inlined_call_operand.hbm [shape: f32[64,128], index: 0, kind: input, shape index: {}]   ;;  %s1140_s1 = inlined_call_operand.hbm [shape: f32[128,128], index: 1, kind: input, shape index: {}]   ;;  %s1141_s2 = inlined_call_operand.vmem [shape: f32[1,128], index: 2, kind: input, shape index: {}]   ;;  %s1142_s3 = inlined_call_operand.hbm [shape: f32[256,128], index: 3, kind: input, shape index: {}]   ;;  %s1143_s4 = inlined_call_operand.vmem [shape: f32[1,128], index: 4, kind: input, shape index: {}]   ;;  %s1144_s5 = inlined_call_operand.hbm [shape: f32[64,128], index: 5, kind: output, shape index: {}]  }
   0x1   :  { %1147 = sst [smem:[#allocation13_spill]] %s1140_s1 }
   0x2   :  { %1148 = sst [smem:[#allocation14_spill]] %s1142_s3 }
   0x3   :  { %10 = vsyncpa [#allocation4], 0 }
   0x4   :  { %12 = vsyncpa [#allocation4 + $0x1], 0 }
   0x5   :  { %13 = vsyncpa [#allocation7], 0 }
   0x6   :  { %14 = vsyncpa [#allocation5], 0 }
   0x7   :  { %16 = vsyncpa [#allocation5 + $0x1], 0  ;;  %s968_s18 = smov 0   ;;  %s970_s19 = smov 0  }
   0x8   :  { %s972_s20 = smov 0   ;;  %s974_s21 = smov 0  }
   0x9   :  { %s976_s22 = smov 0   ;;  %s978_s23 = smov 0  }
   0xa LB: > { %s627_s24 = sadd.s32 4294967295, %s930_s23   ;;  %s628_s25 = sadd.s32 4294967294, %s930_s23   ;;  %s930_s23 = sphi %s978_s23, %s22_s23   ;;  %s926_s22 = sphi %s976_s22, %s1162_s22   ;;  %s922_s21 = sphi %s974_s21, %s1161_s21   ;;  %s918_s20 = sphi %s972_s20, %s1160_s20   ;;  %s914_s19 = sphi %s970_s19, %s1159_s19   ;;  %s910_s18 = sphi %s968_s18, %s1158_s18  }
   0xb   : > { %p54_p0 = scmp.ne.s32.totalorder %s914_s19, %s910_s18  ;;  %p1004_p1 = scmp.eq.s32.totalorder %s627_s24, 0 }
   0xc   : > { %p180_p2 = scmp.eq.s32.totalorder %s628_s25, 1  ;;  %p629_p4 = scmp.ge.s32.totalorder %s930_s23, 1 }
   0xd   : > { %p1010_p3 = por %p1004_p1, %p54_p0  ;;  %p187_p6 = scmp.lt.s32.totalorder %s930_s23, 3 }
   0xe   : > { %p1015_p5 = por %p180_p2, %p54_p0  ;;  %s1152_s1 = sld [smem:[#allocation13_spill]] }
   0xf   : > { %p1023_p7 = pnand %p629_p4, %p187_p6  ;;  %s932_s8 = smov [#allocation6]  }
  0x10   : > { %s200_s9 = sshll.u32 %s932_s8, 4  ;;  %p633_p10 = scmp.ge.s32.totalorder %s930_s23, 2  ;;  %s201_s9 = int_to_ptr.vmem [resolvable:$true] %s200_s9 }
  0x11   : > { %p677_p8 = pneg %p1023_p7  ;;  %s1154_s3 = sld [smem:[#allocation14_spill]] }
  0x12   : > { %s1145_s13 = smov 128   ;;  %s1146_s14 = smov 8  }
  0x13   : > { %p678_p9 = pnand %p677_p8, %p1004_p1  ;;  %s935_s15 = smov [#allocation8]  }
  0x14   : > { %s198_s6 = sshll.u32 %s1152_s1, 4  ;;  %s219_s16 = sshll.u32 %s935_s15, 4  ;;  %s199_s6 = int_to_ptr.hbm [resolvable:$true] %s198_s6  ;;  %s220_s16 = int_to_ptr.vmem [resolvable:$true] %s219_s16 }
  0x15   : > { %680 = dma.hbm_to_vmem [thread:$0]  (!%p678_p9), %s199_s6, 2048, %s201_s9, [#allocation7], %s1145_s13, %s1145_s13, %s1146_s14  }
  0x16   : > { %p174_p11 = scmp.eq.s32.totalorder %s627_s24, 1  ;;  %s34_s17 = sadd.s32 1, %s926_s22 }
  0x17   : > { %s217_s12 = sshll.u32 %s1154_s3, 4  ;;  %p36_p12 = scmp.ge.s32.totalorder %s34_s17, 2  ;;  %s218_s12 = int_to_ptr.hbm [resolvable:$true] %s217_s12 }
  0x18   : > { %683 = dma.hbm_to_vmem [thread:$0]  (!%p678_p9), %s218_s12, 4096, %s220_s16, [#allocation7], %s1145_s13, %s1145_s13, %s1146_s14  }
  0x19   : > { %s41_s25 = sadd.s32 1, %s918_s20  ;;  %p48_p13 = scmp.ne.s32.totalorder %s918_s20, %s914_s19 }
  0x1a   : > { %p49_p0 = scmp.eq.s32.totalorder %s930_s23, 0  ;;  %s1164_s17 = smov (%p36_p12, %s34_s17), 0 }
  0x1b   : > { %p1050_p2 = por %p174_p11, %p48_p13  ;;  %p694_p4 = scmp.lt.s32.totalorder %s930_s23, 2 }
  0x1c   : > { %s38_s30 = ssub.s32 %s926_s22, %s1164_s17  ;;  %s239_s6 = sand.u32 1, %s918_s20  }
  0x1d   : > { %p39_p6 = scmp.eq.s32.totalorder %s38_s30, 0  ;;  %p50_p8 = por %p49_p0, %p48_p13 }
  0x1e   : > { %s634_s8 = sshll.u32 %s239_s6, 5  ;;  %s647_s24 = sshll.u32 %s926_s22, 5 }
  0x1f   : > { %s1060_s9 = scalar_select %p39_p6, %s918_s20, %s41_s25  }
  0x20   : > { %s248_s12 = scalar_lea.hbm %s1139_s0, %s647_s24  ;;  %s243_s16 = scalar_lea.vmem [#allocation3], %s634_s8 }
  0x21   : > { %s249_s15 = sshll.u32 %s248_s12, 4  ;;  %s251_s13 = sshll.u32 %s243_s16, 4  ;;  %s250_s15 = int_to_ptr.hbm [resolvable:$true] %s249_s15  ;;  %s252_s13 = int_to_ptr.vmem [resolvable:$true] %s251_s13 }
  0x22   : > { %p685_p9 = pnand %p694_p4, %p50_p8  ;;  %s240_s14 = scalar_lea.sflag [#allocation4], %s239_s6 }
  0x23   : > { %s1156_s1 = smov 8   ;;  %s1157_s3 = smov 128  }
  0x24   : > { %687 = dma.hbm_to_vmem [thread:$0]  (!%p685_p9), %s250_s15, 512, %s252_s13, %s240_s14, %s1157_s3, %s1157_s3, %s1156_s1  }
  0x25   : > { %263 = sbr.rel (%p1023_p7) target bundleno = 371 (0x173), region = 40  ;;  %s1073_s25 = sand.u32 (!%p1023_p7), 1, %s914_s19  }
  0x26   : > { %s638_s30 = sshll.u32 (!%p1023_p7), %s1073_s25, 5  ;;  %s266_s8 = scalar_lea.sflag (!%p1023_p7), [#allocation4], %s1073_s25 }
  0x27   : > { %s1079_s24 = scalar_lea.vmem (!%p1023_p7), [#allocation3], %s638_s30 }
  0x2a   : > { %897 = dma.done.wait (%p1010_p3), %s266_s8, 512  }
  0x2b   : > { %899 = vsyncadd (%p1010_p3), %s266_s8, 4294966784 }
  0x2c   : > { %901 = dma.done.wait (%p1004_p1), [#allocation7], 6144  }
  0x2d   : > { %903 = vsyncadd (%p1004_p1), [#allocation7], 4294961152  ;;  %v338_v0 = vld [vmem:[#allocation6 + $0x78] sm:$0xff]  ;;  %v337_v1 = vld [vmem:[#allocation6 + $0x70] sm:$0xff]  ;;  %s309_s7 = scalar_lea.vmem [#allocation9], %s638_s30  ;;  %s648_s13 = sshll.u32 %s922_s21, 5 }
  0x2e   : > { %343 = vmatpush.msra.mxu0 %v338_v0  ;;  %649 = vmatpush.msra.mxu3 %v338_v0  ;;  %v336_v2 = vld [vmem:[#allocation6 + $0x68] sm:$0xff]  ;;  %v335_v3 = vld [vmem:[#allocation6 + $0x60] sm:$0xff]  ;;  %v334_v4 = vld [vmem:[#allocation6 + $0x58] sm:$0xff]  ;;  %s507_s10 = scalar_lea.hbm %s1144_s5, %s648_s13  ;;  %s508_s11 = sshll.u32 %s309_s7, 4  ;;  %s509_s11 = int_to_ptr.vmem [resolvable:$true] %s508_s11 }
  0x2f   : > { %v333_v5 = vld [vmem:[#allocation6 + $0x50] sm:$0xff]  ;;  %v332_v6 = vld [vmem:[#allocation6 + $0x48] sm:$0xff]  ;;  %v331_v7 = vld [vmem:[#allocation6 + $0x40] sm:$0xff]  ;;  %s510_s12 = sshll.u32 %s507_s10, 4  ;;  %s495_s15 = scalar_lea.sflag [#allocation5], %s1073_s25  ;;  %s511_s12 = int_to_ptr.hbm [resolvable:$true] %s510_s12 }
  0x30   : > { %344 = vmatpush.msra.mxu0 %v337_v1  ;;  %650 = vmatpush.msra.mxu3 %v337_v1  ;;  %v330_v8 = vld [vmem:[#allocation6 + $0x38] sm:$0xff]  ;;  %v329_v9 = vld [vmem:[#allocation6 + $0x30] sm:$0xff]  ;;  %v328_v14 = vld [vmem:[#allocation6 + $0x28] sm:$0xff]  ;;  %s858_s16 = sshra.s32 %s511_s12, 4  ;;  %s859_s16 = int_to_ptr.hbm [resolvable:$true] %s858_s16 }
  0x31   : > { %v423_v10 = vld [vmem:[#allocation8 + $0xf8] sm:$0xff]  ;;  %v422_v12 = vld [vmem:[#allocation8 + $0xf0] sm:$0xff]  ;;  %v421_v15 = vld [vmem:[#allocation8 + $0xe8] sm:$0xff]  ;;  %s860_s21 = scalar_lea.hbm %s859_s16, 32  ;;  %p865_p11 = scmp.lt.s32.totalorder %s859_s16, %s1144_s5 }
  0x32   : > { %345 = vmatpush.msra.mxu0 %v336_v2  ;;  %651 = vmatpush.msra.mxu3 %v336_v2  ;;  %v407_v11 = vld [vmem:[#allocation8 + $0x78] sm:$0xff]  ;;  %v406_v13 = vld [vmem:[#allocation8 + $0x70] sm:$0xff]  ;;  %v405_v16 = vld [vmem:[#allocation8 + $0x68] sm:$0xff]  ;;  %p861_p1 = scmp.ne.s32.totalorder %s859_s16, %s860_s21 }
  0x33   : > { %457 = vmatpush.msra.mxu2 %v423_v10  ;;  %428 = vmatpush.msra.mxu1 %v407_v11  ;;  %v327_v17 = vld [vmem:[#allocation6 + $0x20] sm:$0xff]  ;;  %v326_v20 = vld [vmem:[#allocation6 + $0x18] sm:$0xff]  ;;  %v325_v23 = vld [vmem:[#allocation6 + $0x10] sm:$0xff] }
  0x34   : > { %346 = vmatpush.msra.mxu0 %v335_v3  ;;  %652 = vmatpush.msra.mxu3 %v335_v3  ;;  %v420_v18 = vld [vmem:[#allocation8 + $0xe0] sm:$0xff]  ;;  %v419_v21 = vld [vmem:[#allocation8 + $0xd8] sm:$0xff]  ;;  %v418_v24 = vld [vmem:[#allocation8 + $0xd0] sm:$0xff]  ;;  %p862_p3 = pnand %p861_p1, %p1050_p2 }
  0x35   : > { %458 = vmatpush.msra.mxu2 %v422_v12  ;;  %429 = vmatpush.msra.mxu1 %v406_v13  ;;  %v404_v19 = vld [vmem:[#allocation8 + $0x60] sm:$0xff]  ;;  %v403_v22 = vld [vmem:[#allocation8 + $0x58] sm:$0xff]  ;;  %v402_v25 = vld [vmem:[#allocation8 + $0x50] sm:$0xff] }
  0x36   : > { %347 = vmatpush.msra.mxu0 %v334_v4  ;;  %653 = vmatpush.msra.mxu3 %v334_v4  ;;  %v324_v26 = vld [vmem:[#allocation6 + $0x8] sm:$0xff]  ;;  %v323_v29 = vld [vmem:[#allocation6] sm:$0xff]  ;;  %v415_v34 = vld [vmem:[#allocation8 + $0xb8] sm:$0xff]  ;;  %p863_p7 = pneg %p862_p3 }
  0x37   : > { %459 = vmatpush.msra.mxu2 %v421_v15  ;;  %430 = vmatpush.msra.mxu1 %v405_v16  ;;  %v417_v27 = vld [vmem:[#allocation8 + $0xc8] sm:$0xff]  ;;  %v319_v30 = vld [vmem:[%s1079_s24] sm:$0xff]  ;;  %v399_v35 = vld [vmem:[#allocation8 + $0x38] sm:$0xff] }
  0x38   : > { %348 = vmatpush.msra.mxu0 %v333_v5  ;;  %654 = vmatpush.msra.mxu3 %v333_v5  ;;  %v401_v28 = vld [vmem:[#allocation8 + $0x48] sm:$0xff]  ;;  %v416_v32 = vld [vmem:[#allocation8 + $0xc0] sm:$0xff]  ;;  %v414_v36 = vld [vmem:[#allocation8 + $0xb0] sm:$0xff] }
  0x39   : > { %460 = vmatpush.msra.mxu2 %v420_v18  ;;  %431 = vmatpush.msra.mxu1 %v404_v19  ;;  %v320_v31 = vld [vmem:[%s1079_s24 + $0x8] sm:$0xff]  ;;  %v400_v33 = vld [vmem:[#allocation8 + $0x40] sm:$0xff]  ;;  %v398_v37 = vld [vmem:[#allocation8 + $0x30] sm:$0xff] }
  0x3a   : > { %349 = vmatpush.msra.mxu0 %v332_v6  ;;  %655 = vmatpush.msra.mxu3 %v332_v6  ;;  %v413_v38 = vld [vmem:[#allocation8 + $0xa8] sm:$0xff]  ;;  %v321_v40 = vld [vmem:[%s1079_s24 + $0x10] sm:$0xff]  ;;  %v412_v41 = vld [vmem:[#allocation8 + $0xa0] sm:$0xff] }
  0x3b   : > { %461 = vmatpush.msra.mxu2 %v419_v21  ;;  %432 = vmatpush.msra.mxu1 %v403_v22  ;;  %v397_v39 = vld [vmem:[#allocation8 + $0x28] sm:$0xff]  ;;  %v411_v42 = vld [vmem:[#allocation8 + $0x98] sm:$0xff]  ;;  %v396_v44 = vld [vmem:[#allocation8 + $0x20] sm:$0xff] }
  0x3c   : > { %350 = vmatpush.msra.mxu0 %v331_v7  ;;  %656 = vmatpush.msra.mxu3 %v331_v7  ;;  %v322_v43 = vld [vmem:[%s1079_s24 + $0x18] sm:$0xff]  ;;  %v410_v45 = vld [vmem:[#allocation8 + $0x90] sm:$0xff]  ;;  %v409_v47 = vld [vmem:[#allocation8 + $0x88] sm:$0xff]  ;;  %s864_s24 = scalar_lea.hbm %s1144_s5, 64 }
  0x3d   : > { %462 = vmatpush.msra.mxu2 %v418_v24  ;;  %433 = vmatpush.msra.mxu1 %v402_v25  ;;  %v395_v46 = vld [vmem:[#allocation8 + $0x18] sm:$0xff]  ;;  %v394_v48 = vld [vmem:[#allocation8 + $0x10] sm:$0xff]  ;;  %v408_v49 = vld [vmem:[#allocation8 + $0x80] sm:$0xff]  ;;  %p866_p12 = scmp.lt.s32.totalorder %s864_s24, %s860_s21 }
  0x3e   : > { %351 = vmatpush.msra.mxu0 %v330_v8  ;;  %657 = vmatpush.msra.mxu3 %v330_v8  ;;  %v393_v50 = vld [vmem:[#allocation8 + $0x8] sm:$0xff]  ;;  %v392_v51 = vld [vmem:[#allocation8] sm:$0xff] }
  0x3f   : > { %463 = vmatpush.msra.mxu2 %v417_v27  ;;  %434 = vmatpush.msra.mxu1 %v401_v28  ;;  %v752_v52 = vld [vmem:[%s1141_s2] ss:$0 sm:$0xff]  ;;  %p867_p13 = por %p866_p12, %p865_p11 }
  0x40   : > { %352 = vmatpush.msra.mxu0 %v329_v9  ;;  %658 = vmatpush.msra.mxu3 %v329_v9  ;;  %v753_v2 = vld [vmem:[%s1143_s4] ss:$0 sm:$0xff] }
  0x41   : > { %464 = vmatpush.msra.mxu2 %v416_v32  ;;  %435 = vmatpush.msra.mxu1 %v400_v33  ;;  %p868_p0 = pnand %p867_p13, %p863_p7 }
  0x42   : > { %353 = vmatpush.msra.mxu0 %v328_v14  ;;  %659 = vmatpush.msra.mxu3 %v328_v14 }
  0x43   : > { %465 = vmatpush.msra.mxu2 %v415_v34  ;;  %436 = vmatpush.msra.mxu1 %v399_v35 }
  0x44   : > { %354 = vmatpush.msra.mxu0 %v327_v17  ;;  %660 = vmatpush.msra.mxu3 %v327_v17 }
  0x45   : > { %466 = vmatpush.msra.mxu2 %v414_v36  ;;  %437 = vmatpush.msra.mxu1 %v398_v37 }
  0x46   : > { %355 = vmatpush.msra.mxu0 %v326_v20  ;;  %661 = vmatpush.msra.mxu3 %v326_v20 }
  0x47   : > { %467 = vmatpush.msra.mxu2 %v413_v38  ;;  %438 = vmatpush.msra.mxu1 %v397_v39 }
  0x48   : > { %356 = vmatpush.msra.mxu0 %v325_v23  ;;  %662 = vmatpush.msra.mxu3 %v325_v23 }
  0x49   : > { %468 = vmatpush.msra.mxu2 %v412_v41  ;;  %439 = vmatpush.msra.mxu1 %v396_v44 }
  0x4a   : > { %357 = vmatpush.msra.mxu0 %v324_v26  ;;  %663 = vmatpush.msra.mxu3 %v324_v26 }
  0x4b   : > { %469 = vmatpush.msra.mxu2 %v411_v42  ;;  %440 = vmatpush.msra.mxu1 %v395_v46 }
  0x4c   : > { %358 = vmatpush.msra.mxu0 %v323_v29  ;;  %664 = vmatpush.msra.mxu3 %v323_v29 }
  0x4d   : > { %359 = vmatmul.f32.vlgmr.msra.gmra.mxu0 %v319_v30  ;;  %362 = vmatmul.f32.vlgmr.msra.gmra.mxu3 %v320_v31 }
  0x4e   : > { %470 = vmatpush.msra.mxu2 %v410_v45  ;;  %441 = vmatpush.msra.mxu1 %v394_v48 }
  0x50   : > { %471 = vmatpush.msra.mxu2 %v409_v47  ;;  %442 = vmatpush.msra.mxu1 %v393_v50 }
  0x52   : > { %472 = vmatpush.msra.mxu2 %v408_v49  ;;  %443 = vmatpush.msra.mxu1 %v392_v51 }
  0x53   : > { %444 = vmatmul.f32.vlgmr.msra.gmra.mxu1 %v319_v30 }
  0x55   : > { %365 = vmatmul.f32.gmra.mxu3 %v321_v40 }
  0x5b   : > { %447 = vmatmul.f32.gmra.mxu1 %v320_v31 }
  0x5d   : > { %368 = vmatmul.f32.gmra.mxu3 %v322_v43 }
  0x63   : > { %450 = vmatmul.f32.gmra.mxu1 %v321_v40 }
  0x6b   : > { %453 = vmatmul.f32.gmra.mxu1 %v322_v43 }
  0xca   : > { %v360_v53 = vpop.f32.mrf.mxu0 }
  0xcb   : > { %v361_v54 = vadd.f32 %v752_v52, %v360_v53 }
  0xcd   : > { %v372_v55 = vmax.f32 %v361_v54, 0.0 }
  0xcf   : > { %473 = vmatmul.f32.vlgmr.msra.gmra.mxu2 %v372_v55 }
  0xd0   : > { %v363_v56 = vpop.f32.mrf.mxu3  ;;  %v445_v1 = vpop.f32.mrf.mxu1 }
  0xd1   : > { %v364_v57 = vadd.f32 %v752_v52, %v363_v56  ;;  %v446_v3 = vadd.f32 %v753_v2, %v445_v1 }
  0xd3   : > { %v373_v58 = vmax.f32 %v364_v57, 0.0 }
  0xd7   : > { %476 = vmatmul.f32.gmra.mxu2 %v373_v58 }
  0xd8   : > { %v366_v59 = vpop.f32.mrf.mxu3  ;;  %v448_v4 = vpop.f32.mrf.mxu1 }
  0xd9   : > { %v367_v60 = vadd.f32 %v752_v52, %v366_v59  ;;  %v449_v8 = vadd.f32 %v753_v2, %v448_v4 }
  0xdb   : > { %v374_v61 = vmax.f32 %v367_v60, 0.0 }
  0xdf   : > { %479 = vmatmul.f32.gmra.mxu2 %v374_v61 }
  0xe0   : > { %v369_v62 = vpop.f32.mrf.mxu3  ;;  %v451_v10 = vpop.f32.mrf.mxu1 }
  0xe1   : > { %v370_v63 = vadd.f32 %v752_v52, %v369_v62  ;;  %v452_v13 = vadd.f32 %v753_v2, %v451_v10 }
  0xe3   : > { %v375_v0 = vmax.f32 %v370_v63, 0.0 }
  0xe7   : > { %482 = vmatmul.f32.gmra.mxu2 %v375_v0 }
  0xe8   : > { %v454_v16 = vpop.f32.mrf.mxu1 }
  0xe9   : > { %v455_v18 = vadd.f32 %v753_v2, %v454_v16 }
 0x152   : > { %v474_v5 = vpop.f32.mrf.mxu2 }
 0x153   : > { %v475_v6 = vadd.f32 %v474_v5, %v446_v3 }
 0x155   : > { %v486_v7 = vmax.f32 %v475_v6, 0.0 }
 0x157   : > { %490 = vst [vmem:[%s309_s7] sm:$0xff] %v486_v7 }
 0x15a   : > { %v477_v9 = vpop.f32.mrf.mxu2 }
 0x15b   : > { %v478_v11 = vadd.f32 %v477_v9, %v449_v8 }
 0x15d   : > { %v487_v12 = vmax.f32 %v478_v11, 0.0 }
 0x15f   : > { %491 = vst [vmem:[%s309_s7 + $0x8] sm:$0xff] %v487_v12 }
 0x162   : > { %v480_v14 = vpop.f32.mrf.mxu2 }
 0x163   : > { %v481_v15 = vadd.f32 %v480_v14, %v452_v13 }
 0x165   : > { %v488_v17 = vmax.f32 %v481_v15, 0.0 }
 0x167   : > { %492 = vst [vmem:[%s309_s7 + $0x10] sm:$0xff] %v488_v17 }
 0x16a   : > { %v483_v19 = vpop.f32.mrf.mxu2 }
 0x16b   : > { %v484_v20 = vadd.f32 %v483_v19, %v455_v18 }
 0x16d   : > { %v489_v21 = vmax.f32 %v484_v20, 0.0 }
 0x16f   : > { %493 = vst [vmem:[%s309_s7 + $0x18] sm:$0xff] %v489_v21 }
 0x170   : > { %871 = shalt.err (!%p868_p0)
}
 0x171   : > { %s936_s25 = smov 128   ;;  %s937_s26 = smov 8  }
 0x172   : > { %675 = dma.vmem_to_hbm [thread:$0]  (%p1050_p2), %s509_s11, 512, %s511_s12, %s495_s15, %s936_s25, %s936_s25, %s937_s26  }
 0x173 PF: > { %s525_s27 = sand.u32 1, %s910_s18   ;;  %p689_p4 = pnand %p633_p10, %p1015_p5 }
 0x174   : > { %s526_s7 = scalar_lea.sflag [#allocation5], %s525_s27 }
 0x175   : > { %p690_p6 = pneg %p689_p4 }
 0x177   : > { %905 = dma.done.wait (%p690_p6), %s526_s7, 512  }
 0x178   : > { %907 = vsyncadd (%p690_p6), %s526_s7, 4294966784  ;;  %s22_s23 = sadd.s32 1, %s930_s23   ;;  %s1158_s18 = smov %s914_s19 }
 0x179   : > { %p19_p8 = scmp.ge.s32.totalorder %s22_s23, 4   ;;  %s1159_s19 = smov %s918_s20 }
 0x17a   : > { %s1160_s20 = smov %s1060_s9  ;;  %s1161_s21 = smov %s926_s22 }
 0x17b   : > { %s1162_s22 = smov %s1164_s17  ;;  %21 = sbr.rel (!%p19_p8) target bundleno = 10 (0xa), region = 101 }
 0x180   :  { %532 = vsyncpa [#allocation4], 1 }
 0x181   :  { %534 = vsyncpa [#allocation4 + $0x1], 1 }
 0x182   :  { %535 = vsyncpa [#allocation7], 1 }
 0x183   :  { %536 = vsyncpa [#allocation5], 1 }
 0x184   :  { %538 = vsyncpa [#allocation5 + $0x1], 1 }

// kernel: tpu_custom_call.1
= control target key start
LH: loop header
LB: loop body
LE: loop exit
PB: predicated region body
PF: predicated region fallthrough
CT: control target
= control target key end

     0   :  { %s1139_s0 = inlined_call_operand.hbm [shape: f32[64,128], index: 0, kind: input, shape index: {}]   ;;  %s1140_s1 = inlined_call_operand.hbm [shape: f32[128,128], index: 1, kind: input, shape index: {}]   ;;  %s1141_s2 = inlined_call_operand.vmem [shape: f32[1,128], index: 2, kind: input, shape index: {}]   ;;  %s1142_s3 = inlined_call_operand.hbm [shape: f32[256,128], index: 3, kind: input, shape index: {}]   ;;  %s1143_s4 = inlined_call_operand.vmem [shape: f32[1,128], index: 4, kind: input, shape index: {}]   ;;  %s1144_s5 = inlined_call_operand.hbm [shape: f32[64,128], index: 5, kind: output, shape index: {}]  }
   0x1   :  { %1147 = sst [smem:[#allocation13_spill]] %s1140_s1 }
   0x2   :  { %1148 = sst [smem:[#allocation14_spill]] %s1142_s3 }
   0x3   :  { %10 = vsyncpa [#allocation4], 0 }
   0x4   :  { %12 = vsyncpa [#allocation4 + $0x1], 0 }
   0x5   :  { %13 = vsyncpa [#allocation7], 0 }
   0x6   :  { %14 = vsyncpa [#allocation5], 0 }
   0x7   :  { %16 = vsyncpa [#allocation5 + $0x1], 0  ;;  %s968_s18 = smov 0   ;;  %s970_s19 = smov 0  }
   0x8   :  { %s972_s20 = smov 0   ;;  %s974_s21 = smov 0  }
   0x9   :  { %s976_s22 = smov 0   ;;  %s978_s23 = smov 0  }
   0xa LB: > { %s627_s24 = sadd.s32 4294967295, %s930_s23   ;;  %s628_s25 = sadd.s32 4294967294, %s930_s23   ;;  %s930_s23 = sphi %s978_s23, %s22_s23   ;;  %s926_s22 = sphi %s976_s22, %s1162_s22   ;;  %s922_s21 = sphi %s974_s21, %s1161_s21   ;;  %s918_s20 = sphi %s972_s20, %s1160_s20   ;;  %s914_s19 = sphi %s970_s19, %s1159_s19   ;;  %s910_s18 = sphi %s968_s18, %s1158_s18  }
   0xb   : > { %p54_p0 = scmp.ne.s32.totalorder %s914_s19, %s910_s18  ;;  %p1004_p1 = scmp.eq.s32.totalorder %s627_s24, 0 }
   0xc   : > { %p180_p2 = scmp.eq.s32.totalorder %s628_s25, 1  ;;  %p629_p4 = scmp.ge.s32.totalorder %s930_s23, 1 }
   0xd   : > { %p1010_p3 = por %p1004_p1, %p54_p0  ;;  %p187_p6 = scmp.lt.s32.totalorder %s930_s23, 3 }
   0xe   : > { %p1015_p5 = por %p180_p2, %p54_p0  ;;  %s1152_s1 = sld [smem:[#allocation13_spill]] }
   0xf   : > { %p1023_p7 = pnand %p629_p4, %p187_p6  ;;  %s932_s8 = smov [#allocation6]  }
  0x10   : > { %s200_s9 = sshll.u32 %s932_s8, 4  ;;  %p633_p10 = scmp.ge.s32.totalorder %s930_s23, 2  ;;  %s201_s9 = int_to_ptr.vmem [resolvable:$true] %s200_s9 }
  0x11   : > { %p677_p8 = pneg %p1023_p7  ;;  %s1154_s3 = sld [smem:[#allocation14_spill]] }
  0x12   : > { %s1145_s13 = smov 128   ;;  %s1146_s14 = smov 8  }
  0x13   : > { %p678_p9 = pnand %p677_p8, %p1004_p1  ;;  %s935_s15 = smov [#allocation8]  }
  0x14   : > { %s198_s6 = sshll.u32 %s1152_s1, 4  ;;  %s219_s16 = sshll.u32 %s935_s15, 4  ;;  %s199_s6 = int_to_ptr.hbm [resolvable:$true] %s198_s6  ;;  %s220_s16 = int_to_ptr.vmem [resolvable:$true] %s219_s16 }
  0x15   : > { %680 = dma.hbm_to_vmem [thread:$0]  (!%p678_p9), %s199_s6, 2048, %s201_s9, [#allocation7], %s1145_s13, %s1145_s13, %s1146_s14  }
  0x16   : > { %p174_p11 = scmp.eq.s32.totalorder %s627_s24, 1  ;;  %s34_s17 = sadd.s32 1, %s926_s22 }
  0x17   : > { %s217_s12 = sshll.u32 %s1154_s3, 4  ;;  %p36_p12 = scmp.ge.s32.totalorder %s34_s17, 2  ;;  %s218_s12 = int_to_ptr.hbm [resolvable:$true] %s217_s12 }
  0x18   : > { %683 = dma.hbm_to_vmem [thread:$0]  (!%p678_p9), %s218_s12, 4096, %s220_s16, [#allocation7], %s1145_s13, %s1145_s13, %s1146_s14  }
  0x19   : > { %s41_s25 = sadd.s32 1, %s918_s20  ;;  %p48_p13 = scmp.ne.s32.totalorder %s918_s20, %s914_s19 }
  0x1a   : > { %p49_p0 = scmp.eq.s32.totalorder %s930_s23, 0  ;;  %s1164_s17 = smov (%p36_p12, %s34_s17), 0 }
  0x1b   : > { %p1050_p2 = por %p174_p11, %p48_p13  ;;  %p694_p4 = scmp.lt.s32.totalorder %s930_s23, 2 }
  0x1c   : > { %s38_s30 = ssub.s32 %s926_s22, %s1164_s17  ;;  %s239_s6 = sand.u32 1, %s918_s20  }
  0x1d   : > { %p39_p6 = scmp.eq.s32.totalorder %s38_s30, 0  ;;  %p50_p8 = por %p49_p0, %p48_p13 }
  0x1e   : > { %s634_s8 = sshll.u32 %s239_s6, 5  ;;  %s647_s24 = sshll.u32 %s926_s22, 5 }
  0x1f   : > { %s1060_s9 = scalar_select %p39_p6, %s918_s20, %s41_s25  }
  0x20   : > { %s248_s12 = scalar_lea.hbm %s1139_s0, %s647_s24  ;;  %s243_s16 = scalar_lea.vmem [#allocation3], %s634_s8 }
  0x21   : > { %s249_s15 = sshll.u32 %s248_s12, 4  ;;  %s251_s13 = sshll.u32 %s243_s16, 4  ;;  %s250_s15 = int_to_ptr.hbm [resolvable:$true] %s249_s15  ;;  %s252_s13 = int_to_ptr.vmem [resolvable:$true] %s251_s13 }
  0x22   : > { %p685_p9 = pnand %p694_p4, %p50_p8  ;;  %s240_s14 = scalar_lea.sflag [#allocation4], %s239_s6 }
  0x23   : > { %s1156_s1 = smov 8   ;;  %s1157_s3 = smov 128  }
  0x24   : > { %687 = dma.hbm_to_vmem [thread:$0]  (!%p685_p9), %s250_s15, 512, %s252_s13, %s240_s14, %s1157_s3, %s1157_s3, %s1156_s1  }
  0x25   : > { %263 = sbr.rel (%p1023_p7) target bundleno = 371 (0x173), region = 40  ;;  %s1073_s25 = sand.u32 (!%p1023_p7), 1, %s914_s19  }
  0x26   : > { %s638_s30 = sshll.u32 (!%p1023_p7), %s1073_s25, 5  ;;  %s266_s8 = scalar_lea.sflag (!%p1023_p7), [#allocation4], %s1073_s25 }
  0x27   : > { %s1079_s24 = scalar_lea.vmem (!%p1023_p7), [#allocation3], %s638_s30 }
  0x2a   : > { %897 = dma.done.wait (%p1010_p3), %s266_s8, 512  }
  0x2b   : > { %899 = vsyncadd (%p1010_p3), %s266_s8, 4294966784 }
  0x2c   : > { %901 = dma.done.wait (%p1004_p1), [#allocation7], 6144  }
  0x2d   : > { %903 = vsyncadd (%p1004_p1), [#allocation7], 4294961152  ;;  %v338_v0 = vld [vmem:[#allocation6 + $0x78] sm:$0xff]  ;;  %v337_v1 = vld [vmem:[#allocation6 + $0x70] sm:$0xff]  ;;  %s309_s7 = scalar_lea.vmem [#allocation9], %s638_s30  ;;  %s648_s13 = sshll.u32 %s922_s21, 5 }
  0x2e   : > { %343 = vmatpush.msra.mxu0 %v338_v0  ;;  %649 = vmatpush.msra.mxu3 %v338_v0  ;;  %v336_v2 = vld [vmem:[#allocation6 + $0x68] sm:$0xff]  ;;  %v335_v3 = vld [vmem:[#allocation6 + $0x60] sm:$0xff]  ;;  %v334_v4 = vld [vmem:[#allocation6 + $0x58] sm:$0xff]  ;;  %s507_s10 = scalar_lea.hbm %s1144_s5, %s648_s13  ;;  %s508_s11 = sshll.u32 %s309_s7, 4  ;;  %s509_s11 = int_to_ptr.vmem [resolvable:$true] %s508_s11 }
  0x2f   : > { %v333_v5 = vld [vmem:[#allocation6 + $0x50] sm:$0xff]  ;;  %v332_v6 = vld [vmem:[#allocation6 + $0x48] sm:$0xff]  ;;  %v331_v7 = vld [vmem:[#allocation6 + $0x40] sm:$0xff]  ;;  %s510_s12 = sshll.u32 %s507_s10, 4  ;;  %s495_s15 = scalar_lea.sflag [#allocation5], %s1073_s25  ;;  %s511_s12 = int_to_ptr.hbm [resolvable:$true] %s510_s12 }
  0x30   : > { %344 = vmatpush.msra.mxu0 %v337_v1  ;;  %650 = vmatpush.msra.mxu3 %v337_v1  ;;  %v330_v8 = vld [vmem:[#allocation6 + $0x38] sm:$0xff]  ;;  %v329_v9 = vld [vmem:[#allocation6 + $0x30] sm:$0xff]  ;;  %v328_v14 = vld [vmem:[#allocation6 + $0x28] sm:$0xff]  ;;  %s858_s16 = sshra.s32 %s511_s12, 4  ;;  %s859_s16 = int_to_ptr.hbm [resolvable:$true] %s858_s16 }
  0x31   : > { %v423_v10 = vld [vmem:[#allocation8 + $0xf8] sm:$0xff]  ;;  %v422_v12 = vld [vmem:[#allocation8 + $0xf0] sm:$0xff]  ;;  %v421_v15 = vld [vmem:[#allocation8 + $0xe8] sm:$0xff]  ;;  %s860_s21 = scalar_lea.hbm %s859_s16, 32  ;;  %p865_p11 = scmp.lt.s32.totalorder %s859_s16, %s1144_s5 }
  0x32   : > { %345 = vmatpush.msra.mxu0 %v336_v2  ;;  %651 = vmatpush.msra.mxu3 %v336_v2  ;;  %v407_v11 = vld [vmem:[#allocation8 + $0x78] sm:$0xff]  ;;  %v406_v13 = vld [vmem:[#allocation8 + $0x70] sm:$0xff]  ;;  %v405_v16 = vld [vmem:[#allocation8 + $0x68] sm:$0xff]  ;;  %p861_p1 = scmp.ne.s32.totalorder %s859_s16, %s860_s21 }
  0x33   : > { %457 = vmatpush.msra.mxu2 %v423_v10  ;;  %428 = vmatpush.msra.mxu1 %v407_v11  ;;  %v327_v17 = vld [vmem:[#allocation6 + $0x20] sm:$0xff]  ;;  %v326_v20 = vld [vmem:[#allocation6 + $0x18] sm:$0xff]  ;;  %v325_v23 = vld [vmem:[#allocation6 + $0x10] sm:$0xff] }
  0x34   : > { %346 = vmatpush.msra.mxu0 %v335_v3  ;;  %652 = vmatpush.msra.mxu3 %v335_v3  ;;  %v420_v18 = vld [vmem:[#allocation8 + $0xe0] sm:$0xff]  ;;  %v419_v21 = vld [vmem:[#allocation8 + $0xd8] sm:$0xff]  ;;  %v418_v24 = vld [vmem:[#allocation8 + $0xd0] sm:$0xff]  ;;  %p862_p3 = pnand %p861_p1, %p1050_p2 }
  0x35   : > { %458 = vmatpush.msra.mxu2 %v422_v12  ;;  %429 = vmatpush.msra.mxu1 %v406_v13  ;;  %v404_v19 = vld [vmem:[#allocation8 + $0x60] sm:$0xff]  ;;  %v403_v22 = vld [vmem:[#allocation8 + $0x58] sm:$0xff]  ;;  %v402_v25 = vld [vmem:[#allocation8 + $0x50] sm:$0xff] }
  0x36   : > { %347 = vmatpush.msra.mxu0 %v334_v4  ;;  %653 = vmatpush.msra.mxu3 %v334_v4  ;;  %v324_v26 = vld [vmem:[#allocation6 + $0x8] sm:$0xff]  ;;  %v323_v29 = vld [vmem:[#allocation6] sm:$0xff]  ;;  %v415_v34 = vld [vmem:[#allocation8 + $0xb8] sm:$0xff]  ;;  %p863_p7 = pneg %p862_p3 }
  0x37   : > { %459 = vmatpush.msra.mxu2 %v421_v15  ;;  %430 = vmatpush.msra.mxu1 %v405_v16  ;;  %v417_v27 = vld [vmem:[#allocation8 + $0xc8] sm:$0xff]  ;;  %v319_v30 = vld [vmem:[%s1079_s24] sm:$0xff]  ;;  %v399_v35 = vld [vmem:[#allocation8 + $0x38] sm:$0xff] }
  0x38   : > { %348 = vmatpush.msra.mxu0 %v333_v5  ;;  %654 = vmatpush.msra.mxu3 %v333_v5  ;;  %v401_v28 = vld [vmem:[#allocation8 + $0x48] sm:$0xff]  ;;  %v416_v32 = vld [vmem:[#allocation8 + $0xc0] sm:$0xff]  ;;  %v414_v36 = vld [vmem:[#allocation8 + $0xb0] sm:$0xff] }
  0x39   : > { %460 = vmatpush.msra.mxu2 %v420_v18  ;;  %431 = vmatpush.msra.mxu1 %v404_v19  ;;  %v320_v31 = vld [vmem:[%s1079_s24 + $0x8] sm:$0xff]  ;;  %v400_v33 = vld [vmem:[#allocation8 + $0x40] sm:$0xff]  ;;  %v398_v37 = vld [vmem:[#allocation8 + $0x30] sm:$0xff] }
  0x3a   : > { %349 = vmatpush.msra.mxu0 %v332_v6  ;;  %655 = vmatpush.msra.mxu3 %v332_v6  ;;  %v413_v38 = vld [vmem:[#allocation8 + $0xa8] sm:$0xff]  ;;  %v321_v40 = vld [vmem:[%s1079_s24 + $0x10] sm:$0xff]  ;;  %v412_v41 = vld [vmem:[#allocation8 + $0xa0] sm:$0xff] }
  0x3b   : > { %461 = vmatpush.msra.mxu2 %v419_v21  ;;  %432 = vmatpush.msra.mxu1 %v403_v22  ;;  %v397_v39 = vld [vmem:[#allocation8 + $0x28] sm:$0xff]  ;;  %v411_v42 = vld [vmem:[#allocation8 + $0x98] sm:$0xff]  ;;  %v396_v44 = vld [vmem:[#allocation8 + $0x20] sm:$0xff] }
  0x3c   : > { %350 = vmatpush.msra.mxu0 %v331_v7  ;;  %656 = vmatpush.msra.mxu3 %v331_v7  ;;  %v322_v43 = vld [vmem:[%s1079_s24 + $0x18] sm:$0xff]  ;;  %v410_v45 = vld [vmem:[#allocation8 + $0x90] sm:$0xff]  ;;  %v409_v47 = vld [vmem:[#allocation8 + $0x88] sm:$0xff]  ;;  %s864_s24 = scalar_lea.hbm %s1144_s5, 64 }
  0x3d   : > { %462 = vmatpush.msra.mxu2 %v418_v24  ;;  %433 = vmatpush.msra.mxu1 %v402_v25  ;;  %v395_v46 = vld [vmem:[#allocation8 + $0x18] sm:$0xff]  ;;  %v394_v48 = vld [vmem:[#allocation8 + $0x10] sm:$0xff]  ;;  %v408_v49 = vld [vmem:[#allocation8 + $0x80] sm:$0xff]  ;;  %p866_p12 = scmp.lt.s32.totalorder %s864_s24, %s860_s21 }
  0x3e   : > { %351 = vmatpush.msra.mxu0 %v330_v8  ;;  %657 = vmatpush.msra.mxu3 %v330_v8  ;;  %v393_v50 = vld [vmem:[#allocation8 + $0x8] sm:$0xff]  ;;  %v392_v51 = vld [vmem:[#allocation8] sm:$0xff] }
  0x3f   : > { %463 = vmatpush.msra.mxu2 %v417_v27  ;;  %434 = vmatpush.msra.mxu1 %v401_v28  ;;  %v752_v52 = vld [vmem:[%s1141_s2] ss:$0 sm:$0xff]  ;;  %p867_p13 = por %p866_p12, %p865_p11 }
  0x40   : > { %352 = vmatpush.msra.mxu0 %v329_v9  ;;  %658 = vmatpush.msra.mxu3 %v329_v9  ;;  %v753_v2 = vld [vmem:[%s1143_s4] ss:$0 sm:$0xff] }
  0x41   : > { %464 = vmatpush.msra.mxu2 %v416_v32  ;;  %435 = vmatpush.msra.mxu1 %v400_v33  ;;  %p868_p0 = pnand %p867_p13, %p863_p7 }
  0x42   : > { %353 = vmatpush.msra.mxu0 %v328_v14  ;;  %659 = vmatpush.msra.mxu3 %v328_v14 }
  0x43   : > { %465 = vmatpush.msra.mxu2 %v415_v34  ;;  %436 = vmatpush.msra.mxu1 %v399_v35 }
  0x44   : > { %354 = vmatpush.msra.mxu0 %v327_v17  ;;  %660 = vmatpush.msra.mxu3 %v327_v17 }
  0x45   : > { %466 = vmatpush.msra.mxu2 %v414_v36  ;;  %437 = vmatpush.msra.mxu1 %v398_v37 }
  0x46   : > { %355 = vmatpush.msra.mxu0 %v326_v20  ;;  %661 = vmatpush.msra.mxu3 %v326_v20 }
  0x47   : > { %467 = vmatpush.msra.mxu2 %v413_v38  ;;  %438 = vmatpush.msra.mxu1 %v397_v39 }
  0x48   : > { %356 = vmatpush.msra.mxu0 %v325_v23  ;;  %662 = vmatpush.msra.mxu3 %v325_v23 }
  0x49   : > { %468 = vmatpush.msra.mxu2 %v412_v41  ;;  %439 = vmatpush.msra.mxu1 %v396_v44 }
  0x4a   : > { %357 = vmatpush.msra.mxu0 %v324_v26  ;;  %663 = vmatpush.msra.mxu3 %v324_v26 }
  0x4b   : > { %469 = vmatpush.msra.mxu2 %v411_v42  ;;  %440 = vmatpush.msra.mxu1 %v395_v46 }
  0x4c   : > { %358 = vmatpush.msra.mxu0 %v323_v29  ;;  %664 = vmatpush.msra.mxu3 %v323_v29 }
  0x4d   : > { %359 = vmatmul.f32.vlgmr.msra.gmra.mxu0 %v319_v30  ;;  %362 = vmatmul.f32.vlgmr.msra.gmra.mxu3 %v320_v31 }
  0x4e   : > { %470 = vmatpush.msra.mxu2 %v410_v45  ;;  %441 = vmatpush.msra.mxu1 %v394_v48 }
  0x50   : > { %471 = vmatpush.msra.mxu2 %v409_v47  ;;  %442 = vmatpush.msra.mxu1 %v393_v50 }
  0x52   : > { %472 = vmatpush.msra.mxu2 %v408_v49  ;;  %443 = vmatpush.msra.mxu1 %v392_v51 }
  0x53   : > { %444 = vmatmul.f32.vlgmr.msra.gmra.mxu1 %v319_v30 }
  0x55   : > { %365 = vmatmul.f32.gmra.mxu3 %v321_v40 }
  0x5b   : > { %447 = vmatmul.f32.gmra.mxu1 %v320_v31 }
  0x5d   : > { %368 = vmatmul.f32.gmra.mxu3 %v322_v43 }
  0x63   : > { %450 = vmatmul.f32.gmra.mxu1 %v321_v40 }
  0x6b   : > { %453 = vmatmul.f32.gmra.mxu1 %v322_v43 }
  0xca   : > { %v360_v53 = vpop.f32.mrf.mxu0 }
  0xcb   : > { %v361_v54 = vadd.f32 %v752_v52, %v360_v53 }
  0xcd   : > { %v372_v55 = vmax.f32 %v361_v54, 0.0 }
  0xcf   : > { %473 = vmatmul.f32.vlgmr.msra.gmra.mxu2 %v372_v55 }
  0xd0   : > { %v363_v56 = vpop.f32.mrf.mxu3  ;;  %v445_v1 = vpop.f32.mrf.mxu1 }
  0xd1   : > { %v364_v57 = vadd.f32 %v752_v52, %v363_v56  ;;  %v446_v3 = vadd.f32 %v753_v2, %v445_v1 }
  0xd3   : > { %v373_v58 = vmax.f32 %v364_v57, 0.0 }
  0xd7   : > { %476 = vmatmul.f32.gmra.mxu2 %v373_v58 }
  0xd8   : > { %v366_v59 = vpop.f32.mrf.mxu3  ;;  %v448_v4 = vpop.f32.mrf.mxu1 }
  0xd9   : > { %v367_v60 = vadd.f32 %v752_v52, %v366_v59  ;;  %v449_v8 = vadd.f32 %v753_v2, %v448_v4 }
  0xdb   : > { %v374_v61 = vmax.f32 %v367_v60, 0.0 }
  0xdf   : > { %479 = vmatmul.f32.gmra.mxu2 %v374_v61 }
  0xe0   : > { %v369_v62 = vpop.f32.mrf.mxu3  ;;  %v451_v10 = vpop.f32.mrf.mxu1 }
  0xe1   : > { %v370_v63 = vadd.f32 %v752_v52, %v369_v62  ;;  %v452_v13 = vadd.f32 %v753_v2, %v451_v10 }
  0xe3   : > { %v375_v0 = vmax.f32 %v370_v63, 0.0 }
  0xe7   : > { %482 = vmatmul.f32.gmra.mxu2 %v375_v0 }
  0xe8   : > { %v454_v16 = vpop.f32.mrf.mxu1 }
  0xe9   : > { %v455_v18 = vadd.f32 %v753_v2, %v454_v16 }
 0x152   : > { %v474_v5 = vpop.f32.mrf.mxu2 }
 0x153   : > { %v475_v6 = vadd.f32 %v474_v5, %v446_v3 }
 0x155   : > { %v486_v7 = vmax.f32 %v475_v6, 0.0 }
 0x157   : > { %490 = vst [vmem:[%s309_s7] sm:$0xff] %v486_v7 }
 0x15a   : > { %v477_v9 = vpop.f32.mrf.mxu2 }
 0x15b   : > { %v478_v11 = vadd.f32 %v477_v9, %v449_v8 }
 0x15d   : > { %v487_v12 = vmax.f32 %v478_v11, 0.0 }
 0x15f   : > { %491 = vst [vmem:[%s309_s7 + $0x8] sm:$0xff] %v487_v12 }
 0x162   : > { %v480_v14 = vpop.f32.mrf.mxu2 }
 0x163   : > { %v481_v15 = vadd.f32 %v480_v14, %v452_v13 }
 0x165   : > { %v488_v17 = vmax.f32 %v481_v15, 0.0 }
 0x167   : > { %492 = vst [vmem:[%s309_s7 + $0x10] sm:$0xff] %v488_v17 }
 0x16a   : > { %v483_v19 = vpop.f32.mrf.mxu2 }
 0x16b   : > { %v484_v20 = vadd.f32 %v483_v19, %v455_v18 }
 0x16d   : > { %v489_v21 = vmax.f32 %v484_v20, 0.0 }
 0x16f   : > { %493 = vst [vmem:[%s309_s7 + $0x18] sm:$0xff] %v489_v21 }
 0x170   : > { %871 = shalt.err (!%p868_p0)
}
 0x171   : > { %s936_s25 = smov 128   ;;  %s937_s26 = smov 8  }
 0x172   : > { %675 = dma.vmem_to_hbm [thread:$0]  (%p1050_p2), %s509_s11, 512, %s511_s12, %s495_s15, %s936_s25, %s936_s25, %s937_s26  }
 0x173 PF: > { %s525_s27 = sand.u32 1, %s910_s18   ;;  %p689_p4 = pnand %p633_p10, %p1015_p5 }
 0x174   : > { %s526_s7 = scalar_lea.sflag [#allocation5], %s525_s27 }
 0x175   : > { %p690_p6 = pneg %p689_p4 }
 0x177   : > { %905 = dma.done.wait (%p690_p6), %s526_s7, 512  }
 0x178   : > { %907 = vsyncadd (%p690_p6), %s526_s7, 4294966784  ;;  %s22_s23 = sadd.s32 1, %s930_s23   ;;  %s1158_s18 = smov %s914_s19 }
 0x179   : > { %p19_p8 = scmp.ge.s32.totalorder %s22_s23, 4   ;;  %s1159_s19 = smov %s918_s20 }
 0x17a   : > { %s1160_s20 = smov %s1060_s9  ;;  %s1161_s21 = smov %s926_s22 }
 0x17b   : > { %s1162_s22 = smov %s1164_s17  ;;  %21 = sbr.rel (!%p19_p8) target bundleno = 10 (0xa), region = 101 }
 0x180   :  { %532 = vsyncpa [#allocation4], 1 }
 0x181   :  { %534 = vsyncpa [#allocation4 + $0x1], 1 }
 0x182   :  { %535 = vsyncpa [#allocation7], 1 }
 0x183   :  { %536 = vsyncpa [#allocation5], 1 }
 0x184   :  { %538 = vsyncpa [#allocation5 + $0x1], 1 }

</bundles_post_ra>
